<compile_context>
chip_gen: v7x
topology: tpu7x:2x2x1
jax: 0.10.0
libtpu: 0.0.40
codegen_flags: <defaults>
</compile_context>

<pallas_src>
import functools

import jax
import jax.numpy as jnp
import numpy as np
from jax import lax
from jax.experimental import pallas as pl
from jax.experimental.pallas import tpu as pltpu


def _conv_ps_kernel(x_ref, w_ref, b_ref, o_ref, patch_ref, *,
                    H, W, K, Cin, pad):
    """Per-image fused 'same' conv (stride 1) producing (Cout2, H*W).

    x_ref     : (1, Cin, H*W)     flattened NCHW input tile, pixels on lanes
    w_ref     : (Cout2, K*K*Cin)  flattened conv weight
    b_ref     : (Cout2, 1)        bias
    o_ref     : (1, Cout2, H*W)   conv output, pixels on lanes
    patch_ref : (K*K*Cin, H*W)    VMEM scratch: im2col slab (dot-operand layout)
    """
    HW = H * W
    x = x_ref[0]                                     # (Cin, HW), lane-dense

    # Per-lane column index (w coordinate) for the 'same'-padding column mask.
    lane = lax.broadcasted_iota(jnp.int32, (Cin, HW), 1)
    w_idx = lane % W

    def shift_lanes(v, shift):
        # s[:, p] = v[:, p + shift] if 0 <= p + shift < HW else 0
        if shift == 0:
            return v
        zeros = jnp.zeros((v.shape[0], abs(shift)), v.dtype)
        if shift > 0:
            return jnp.concatenate([v[:, shift:], zeros], axis=1)
        return jnp.concatenate([zeros, v[:, :shift]], axis=1)

    # im2col: patch[(kh*K + kw)*Cin + ci, h*W + w] = x_pad[ci, h+kh, w+kw].
    # Row under/overflow of the padded image is handled by the zero fill of
    # the flat shift; column wrap across the W boundary is masked per lane.
    for kh in range(K):
        for kw in range(K):
            dy, dx = kh - pad, kw - pad
            s = shift_lanes(x, dy * W + dx)
            if dx > 0:
                s = jnp.where(w_idx < W - dx, s, 0.0)
            elif dx < 0:
                s = jnp.where(w_idx >= -dx, s, 0.0)
            c0 = (kh * K + kw) * Cin
            patch_ref[c0:c0 + Cin, :] = s            # lane-dense store

    # One MXU matmul over the whole K*K*Cin contraction, f32 accumulation.
    acc = lax.dot_general(w_ref[...], patch_ref[...],
                          dimension_numbers=(((1,), (0,)), ((), ())),
                          preferred_element_type=jnp.float32)
    acc = acc + b_ref[...]                           # (Cout2, 1) broadcast
    o_ref[0] = acc.astype(o_ref.dtype)               # lane-dense store


def pixel_shuffle_pack(x_nchw, weight, bias, scale_factor):
    """Forward pass matching PyTorch PixelShufflePack.

    x_nchw : (N, Cin, H, W)
    weight : (Cout*r*r, Cin, K, K)   -- PyTorch Conv2d layout
    bias   : (Cout*r*r,)
    returns: (N, Cout, H*r, W*r)
    """
    N, Cin, H, W = x_nchw.shape
    Cout2, Cin_w, K, K2 = weight.shape
    assert Cin_w == Cin and K == K2
    assert K % 2 == 1, "'same' padding assumes an odd upsample_kernel"
    r = scale_factor
    Cout = Cout2 // (r * r)
    assert Cout * r * r == Cout2
    pad = (K - 1) // 2
    assert H > pad and W > pad
    HW = H * W

    # Wrapper glue (all bitcasts / tiny one-off transposes on the weight):
    # pixels flattened onto the lane axis; weight columns ordered (kh, kw, ci)
    # to match the in-kernel im2col row layout.
    x_flat = x_nchw.reshape(N, Cin, HW)                       # pure bitcast
    w_flat = jnp.transpose(weight, (0, 2, 3, 1)).reshape(Cout2, K * K * Cin)
    b2 = bias.reshape(Cout2, 1)

    kernel = functools.partial(_conv_ps_kernel, H=H, W=W, K=K, Cin=Cin,
                               pad=pad)

    conv_out = pl.pallas_call(
        kernel,
        out_shape=jax.ShapeDtypeStruct((N, Cout2, HW), x_nchw.dtype),
        grid_spec=pltpu.PrefetchScalarGridSpec(
            num_scalar_prefetch=0,
            grid=(N,),
            in_specs=[
                pl.BlockSpec((1, Cin, HW), lambda n: (n, 0, 0)),
                pl.BlockSpec((Cout2, K * K * Cin), lambda n: (0, 0)),
                pl.BlockSpec((Cout2, 1), lambda n: (0, 0)),
            ],
            out_specs=pl.BlockSpec((1, Cout2, HW), lambda n: (n, 0, 0)),
            scratch_shapes=[
                pltpu.VMEM((K * K * Cin, HW), x_nchw.dtype),
            ],
        ),
        compiler_params=pltpu.CompilerParams(
            dimension_semantics=("parallel",)),
    )(x_flat, w_flat, b2)

    # Pixel-shuffle epilogue: both reshapes are layout-preserving bitcasts;
    # only the transpose moves data (see TODO about fusing it).
    y = conv_out.reshape(N, Cout, r, r, H, W)        # (n, co, dy, dx, h, w)
    y = jnp.transpose(y, (0, 1, 4, 2, 5, 3))         # (n, co, h, dy, w, dx)
    return y.reshape(N, Cout, H * r, W * r)


def _reference(x_nchw, weight, bias, scale_factor):
    """Pure-JAX reference (lax conv + pixel shuffle) for correctness check."""
    K = weight.shape[-1]
    pad = (K - 1) // 2
    out = jax.lax.conv_general_dilated(
        x_nchw, weight, window_strides=(1, 1),
        padding=((pad, pad), (pad, pad)),
        dimension_numbers=("NCHW", "OIHW", "NCHW"))
    out = out + bias[None, :, None, None]
    N, C2, H, W = out.shape
    r = scale_factor
    C = C2 // (r * r)
    out = out.reshape(N, C, r, r, H, W)
    out = jnp.transpose(out, (0, 1, 4, 2, 5, 3))
    return out.reshape(N, C, H * r, W * r)


if __name__ == "__main__":
    in_channels = 4
    out_channels = 4
    scale_factor = 2
    upsample_kernel = 3

    N, H, W = 2, 16, 16
    Cout2 = out_channels * scale_factor * scale_factor

    key = jax.random.PRNGKey(0)
    kx, kw, kb = jax.random.split(key, 3)
    x = jax.random.normal(kx, (N, in_channels, H, W), dtype=jnp.float32)
    # Deterministic synthetic init (stands in for default_init_weights).
    weight = 0.1 * jax.random.normal(
        kw, (Cout2, in_channels, upsample_kernel, upsample_kernel),
        dtype=jnp.float32)
    bias = 0.1 * jax.random.normal(kb, (Cout2,), dtype=jnp.float32)

    out = pixel_shuffle_pack(x, weight, bias, scale_factor)
    out = jax.block_until_ready(out)

    ref = _reference(x, weight, bias, scale_factor)
    assert out.shape == (N, out_channels, H * scale_factor, W * scale_factor)
    np.testing.assert_allclose(np.asarray(out), np.asarray(ref),
                               rtol=1e-5, atol=1e-5)
    print("KERNEL_OK")
</pallas_src>

<mosaic_0001>
module attributes {stable_mosaic.version = 11 : i64} {
  func.func @_conv_ps_kernel(%arg0: i32, %arg1: memref<1x4x256xf32, #tpu.memory_space<vmem>>, %arg2: memref<16x36xf32, #tpu.memory_space<vmem>>, %arg3: memref<16x1xf32, #tpu.memory_space<vmem>>, %arg4: memref<1x16x256xf32, #tpu.memory_space<vmem>>, %arg5: memref<36x256xf32, #tpu.memory_space<vmem>>) attributes {dimension_semantics = [#tpu.dimension_semantics<parallel>], iteration_bounds = array<i64: 2>, scalar_prefetch = 0 : i64, scratch_operands = 1 : i64, tpu.core_type = #tpu.core_type<tc>, window_params = [{transform_indices = @transform_0, window_bounds = array<i64: 1, 4, 256>}, {pipeline_mode = #tpu.pipeline_mode<synchronous>, transform_indices = @transform_1, window_bounds = array<i64: 16, 36>}, {pipeline_mode = #tpu.pipeline_mode<synchronous>, transform_indices = @transform_2, window_bounds = array<i64: 16, 1>}, {transform_indices = @transform_3, window_bounds = array<i64: 1, 16, 256>}]} {
    %c0 = arith.constant 0 : index
    %c0_0 = arith.constant 0 : index
    %c0_1 = arith.constant 0 : index
    %0 = vector.load %arg1[%c0, %c0_0, %c0_1] : memref<1x4x256xf32, #tpu.memory_space<vmem>>, vector<1x4x256xf32>
    %1 = vector.shape_cast %0 : vector<1x4x256xf32> to vector<4x256xf32>
    %2 = tpu.iota {dimensions = array<i32: 1>} : vector<4x256xi32>
    %c16_i32 = arith.constant 16 : i32
    %c0_i32 = arith.constant 0 : i32
    %3 = arith.cmpi eq, %c16_i32, %c0_i32 : i32
    %c1_i32 = arith.constant 1 : i32
    %4 = arith.select %3, %c1_i32, %c16_i32 : i32
    %5 = vector.broadcast %4 : i32 to vector<4x256xi32>
    %6 = arith.remsi %2, %5 : vector<4x256xi32>
    %c0_i32_2 = arith.constant 0 : i32
    %7 = vector.broadcast %c0_i32_2 : i32 to vector<4x256xi32>
    %8 = arith.cmpi ne, %6, %7 : vector<4x256xi32>
    %c0_i32_3 = arith.constant 0 : i32
    %9 = vector.broadcast %c0_i32_3 : i32 to vector<4x256xi32>
    %10 = arith.cmpi slt, %6, %9 : vector<4x256xi32>
    %c0_i32_4 = arith.constant 0 : i32
    %11 = arith.cmpi slt, %4, %c0_i32_4 : i32
    %12 = vector.broadcast %11 : i1 to vector<4x256xi1>
    %13 = vector.broadcast %12 : vector<4x256xi1> to vector<4x256xi1>
    %14 = arith.xori %10, %13 : vector<4x256xi1>
    %15 = arith.andi %14, %8 : vector<4x256xi1>
    %16 = vector.broadcast %4 : i32 to vector<4x256xi32>
    %17 = arith.addi %6, %16 : vector<4x256xi32>
    %18 = arith.select %15, %17, %6 : vector<4x256xi1>, vector<4x256xi32>
    %cst = arith.constant 0.000000e+00 : f32
    %19 = vector.broadcast %cst : f32 to vector<4x17xf32>
    %20 = vector.extract_strided_slice %1 {offsets = [0, 0], sizes = [4, 239], strides = [1, 1]} : vector<4x256xf32> to vector<4x239xf32>
    %21 = tpu.concatenate %19, %20 in 1 : vector<4x17xf32>, vector<4x239xf32> -> vector<4x256xf32>
    %c1_i32_5 = arith.constant 1 : i32
    %22 = vector.broadcast %c1_i32_5 : i32 to vector<4x256xi32>
    %23 = arith.cmpi sge, %18, %22 : vector<4x256xi32>
    %cst_6 = arith.constant 0.000000e+00 : f32
    %24 = vector.broadcast %cst_6 : f32 to vector<4x256xf32>
    %25 = arith.select %23, %21, %24 : vector<4x256xi1>, vector<4x256xf32>
    %c0_7 = arith.constant 0 : index
    %c0_8 = arith.constant 0 : index
    %26 = vector.load %arg5[%c0_7, %c0_8] : memref<36x256xf32, #tpu.memory_space<vmem>>, vector<4x256xf32>
    tpu.vector_store %arg5[%c0_7, %c0_8], %25 {strides = array<i32>} : memref<36x256xf32, #tpu.memory_space<vmem>>, vector<4x256xf32>,
    %cst_9 = arith.constant 0.000000e+00 : f32
    %27 = vector.broadcast %cst_9 : f32 to vector<4x16xf32>
    %28 = vector.extract_strided_slice %1 {offsets = [0, 0], sizes = [4, 240], strides = [1, 1]} : vector<4x256xf32> to vector<4x240xf32>
    %29 = tpu.concatenate %27, %28 in 1 : vector<4x16xf32>, vector<4x240xf32> -> vector<4x256xf32>
    %c4 = arith.constant 4 : index
    %c0_10 = arith.constant 0 : index
    %30 = vector.load %arg5[%c4, %c0_10] : memref<36x256xf32, #tpu.memory_space<vmem>>, vector<4x256xf32>
    tpu.vector_store %arg5[%c4, %c0_10], %29 {strides = array<i32>} : memref<36x256xf32, #tpu.memory_space<vmem>>, vector<4x256xf32>,
    %cst_11 = arith.constant 0.000000e+00 : f32
    %31 = vector.broadcast %cst_11 : f32 to vector<4x15xf32>
    %32 = vector.extract_strided_slice %1 {offsets = [0, 0], sizes = [4, 241], strides = [1, 1]} : vector<4x256xf32> to vector<4x241xf32>
    %33 = tpu.concatenate %31, %32 in 1 : vector<4x15xf32>, vector<4x241xf32> -> vector<4x256xf32>
    %c15_i32 = arith.constant 15 : i32
    %34 = vector.broadcast %c15_i32 : i32 to vector<4x256xi32>
    %35 = arith.cmpi slt, %18, %34 : vector<4x256xi32>
    %cst_12 = arith.constant 0.000000e+00 : f32
    %36 = vector.broadcast %cst_12 : f32 to vector<4x256xf32>
    %37 = arith.select %35, %33, %36 : vector<4x256xi1>, vector<4x256xf32>
    %c8 = arith.constant 8 : index
    %c0_13 = arith.constant 0 : index
    %38 = vector.load %arg5[%c8, %c0_13] : memref<36x256xf32, #tpu.memory_space<vmem>>, vector<4x256xf32>
    tpu.vector_store %arg5[%c8, %c0_13], %37 {strides = array<i32>} : memref<36x256xf32, #tpu.memory_space<vmem>>, vector<4x256xf32>,
    %cst_14 = arith.constant 0.000000e+00 : f32
    %39 = vector.broadcast %cst_14 : f32 to vector<4x1xf32>
    %40 = vector.extract_strided_slice %1 {offsets = [0, 0], sizes = [4, 255], strides = [1, 1]} : vector<4x256xf32> to vector<4x255xf32>
    %41 = tpu.concatenate %39, %40 in 1 : vector<4x1xf32>, vector<4x255xf32> -> vector<4x256xf32>
    %c1_i32_15 = arith.constant 1 : i32
    %42 = vector.broadcast %c1_i32_15 : i32 to vector<4x256xi32>
    %43 = arith.cmpi sge, %18, %42 : vector<4x256xi32>
    %cst_16 = arith.constant 0.000000e+00 : f32
    %44 = vector.broadcast %cst_16 : f32 to vector<4x256xf32>
    %45 = arith.select %43, %41, %44 : vector<4x256xi1>, vector<4x256xf32>
    %c12 = arith.constant 12 : index
    %c0_17 = arith.constant 0 : index
    %46 = vector.load %arg5[%c12, %c0_17] : memref<36x256xf32, #tpu.memory_space<vmem>>, vector<4x256xf32>
    tpu.vector_store %arg5[%c12, %c0_17], %45 {strides = array<i32>} : memref<36x256xf32, #tpu.memory_space<vmem>>, vector<4x256xf32>,
    %c16 = arith.constant 16 : index
    %c0_18 = arith.constant 0 : index
    %47 = vector.load %arg5[%c16, %c0_18] : memref<36x256xf32, #tpu.memory_space<vmem>>, vector<4x256xf32>
    tpu.vector_store %arg5[%c16, %c0_18], %1 {strides = array<i32>} : memref<36x256xf32, #tpu.memory_space<vmem>>, vector<4x256xf32>,
    %cst_19 = arith.constant 0.000000e+00 : f32
    %48 = vector.broadcast %cst_19 : f32 to vector<4x1xf32>
    %49 = vector.extract_strided_slice %1 {offsets = [0, 1], sizes = [4, 255], strides = [1, 1]} : vector<4x256xf32> to vector<4x255xf32>
    %50 = tpu.concatenate %49, %48 in 1 : vector<4x255xf32>, vector<4x1xf32> -> vector<4x256xf32>
    %c15_i32_20 = arith.constant 15 : i32
    %51 = vector.broadcast %c15_i32_20 : i32 to vector<4x256xi32>
    %52 = arith.cmpi slt, %18, %51 : vector<4x256xi32>
    %cst_21 = arith.constant 0.000000e+00 : f32
    %53 = vector.broadcast %cst_21 : f32 to vector<4x256xf32>
    %54 = arith.select %52, %50, %53 : vector<4x256xi1>, vector<4x256xf32>
    %c20 = arith.constant 20 : index
    %c0_22 = arith.constant 0 : index
    %55 = vector.load %arg5[%c20, %c0_22] : memref<36x256xf32, #tpu.memory_space<vmem>>, vector<4x256xf32>
    tpu.vector_store %arg5[%c20, %c0_22], %54 {strides = array<i32>} : memref<36x256xf32, #tpu.memory_space<vmem>>, vector<4x256xf32>,
    %cst_23 = arith.constant 0.000000e+00 : f32
    %56 = vector.broadcast %cst_23 : f32 to vector<4x15xf32>
    %57 = vector.extract_strided_slice %1 {offsets = [0, 15], sizes = [4, 241], strides = [1, 1]} : vector<4x256xf32> to vector<4x241xf32>
    %58 = tpu.concatenate %57, %56 in 1 : vector<4x241xf32>, vector<4x15xf32> -> vector<4x256xf32>
    %c1_i32_24 = arith.constant 1 : i32
    %59 = vector.broadcast %c1_i32_24 : i32 to vector<4x256xi32>
    %60 = arith.cmpi sge, %18, %59 : vector<4x256xi32>
    %cst_25 = arith.constant 0.000000e+00 : f32
    %61 = vector.broadcast %cst_25 : f32 to vector<4x256xf32>
    %62 = arith.select %60, %58, %61 : vector<4x256xi1>, vector<4x256xf32>
    %c24 = arith.constant 24 : index
    %c0_26 = arith.constant 0 : index
    %63 = vector.load %arg5[%c24, %c0_26] : memref<36x256xf32, #tpu.memory_space<vmem>>, vector<4x256xf32>
    tpu.vector_store %arg5[%c24, %c0_26], %62 {strides = array<i32>} : memref<36x256xf32, #tpu.memory_space<vmem>>, vector<4x256xf32>,
    %cst_27 = arith.constant 0.000000e+00 : f32
    %64 = vector.broadcast %cst_27 : f32 to vector<4x16xf32>
    %65 = vector.extract_strided_slice %1 {offsets = [0, 16], sizes = [4, 240], strides = [1, 1]} : vector<4x256xf32> to vector<4x240xf32>
    %66 = tpu.concatenate %65, %64 in 1 : vector<4x240xf32>, vector<4x16xf32> -> vector<4x256xf32>
    %c28 = arith.constant 28 : index
    %c0_28 = arith.constant 0 : index
    %67 = vector.load %arg5[%c28, %c0_28] : memref<36x256xf32, #tpu.memory_space<vmem>>, vector<4x256xf32>
    tpu.vector_store %arg5[%c28, %c0_28], %66 {strides = array<i32>} : memref<36x256xf32, #tpu.memory_space<vmem>>, vector<4x256xf32>,
    %cst_29 = arith.constant 0.000000e+00 : f32
    %68 = vector.broadcast %cst_29 : f32 to vector<4x17xf32>
    %69 = vector.extract_strided_slice %1 {offsets = [0, 17], sizes = [4, 239], strides = [1, 1]} : vector<4x256xf32> to vector<4x239xf32>
    %70 = tpu.concatenate %69, %68 in 1 : vector<4x239xf32>, vector<4x17xf32> -> vector<4x256xf32>
    %c15_i32_30 = arith.constant 15 : i32
    %71 = vector.broadcast %c15_i32_30 : i32 to vector<4x256xi32>
    %72 = arith.cmpi slt, %18, %71 : vector<4x256xi32>
    %cst_31 = arith.constant 0.000000e+00 : f32
    %73 = vector.broadcast %cst_31 : f32 to vector<4x256xf32>
    %74 = arith.select %72, %70, %73 : vector<4x256xi1>, vector<4x256xf32>
    %c32 = arith.constant 32 : index
    %c0_32 = arith.constant 0 : index
    %75 = vector.load %arg5[%c32, %c0_32] : memref<36x256xf32, #tpu.memory_space<vmem>>, vector<4x256xf32>
    tpu.vector_store %arg5[%c32, %c0_32], %74 {strides = array<i32>} : memref<36x256xf32, #tpu.memory_space<vmem>>, vector<4x256xf32>,
    %c0_33 = arith.constant 0 : index
    %c0_34 = arith.constant 0 : index
    %76 = vector.load %arg2[%c0_33, %c0_34] : memref<16x36xf32, #tpu.memory_space<vmem>>, vector<16x36xf32>
    %c0_35 = arith.constant 0 : index
    %c0_36 = arith.constant 0 : index
    %77 = vector.load %arg5[%c0_35, %c0_36] : memref<36x256xf32, #tpu.memory_space<vmem>>, vector<36x256xf32>
    %cst_37 = arith.constant dense<0.000000e+00> : vector<16x256xf32>
    %78 = tpu.matmul %76, %77, %cst_37 {dimension_numbers = #tpu.dot_dimension_numbers<[1], [0], [0], [1], [0, 0, 1, 1], [], []>} : vector<16x36xf32>, vector<36x256xf32>, vector<16x256xf32> -> vector<16x256xf32>
    %c0_38 = arith.constant 0 : index
    %c0_39 = arith.constant 0 : index
    %79 = vector.load %arg3[%c0_38, %c0_39] : memref<16x1xf32, #tpu.memory_space<vmem>>, vector<16x1xf32>
    %80 = vector.broadcast %79 : vector<16x1xf32> to vector<16x256xf32>
    %81 = arith.addf %78, %80 : vector<16x256xf32>
    %c0_40 = arith.constant 0 : index
    %c0_41 = arith.constant 0 : index
    %c0_42 = arith.constant 0 : index
    %82 = vector.load %arg4[%c0_40, %c0_41, %c0_42] : memref<1x16x256xf32, #tpu.memory_space<vmem>>, vector<1x16x256xf32>
    %83 = vector.shape_cast %82 : vector<1x16x256xf32> to vector<16x256xf32>
    %84 = vector.shape_cast %81 : vector<16x256xf32> to vector<1x16x256xf32>
    tpu.vector_store %arg4[%c0_40, %c0_41, %c0_42], %84 {strides = array<i32>} : memref<1x16x256xf32, #tpu.memory_space<vmem>>, vector<1x16x256xf32>,
    return
  }
  func.func @transform_0(%arg0: i32) -> (i32, i32, i32) {
    %c0_i32 = arith.constant 0 : i32
    %c0_i32_0 = arith.constant 0 : i32
    %c0_i32_1 = arith.constant 0 : i32
    return %arg0, %c0_i32, %c0_i32_0 : i32, i32, i32
  }
  func.func @transform_1(%arg0: i32) -> (i32, i32) {
    %c0_i32 = arith.constant 0 : i32
    %c0_i32_0 = arith.constant 0 : i32
    %c0_i32_1 = arith.constant 0 : i32
    return %c0_i32, %c0_i32_0 : i32, i32
  }
  func.func @transform_2(%arg0: i32) -> (i32, i32) {
    %c0_i32 = arith.constant 0 : i32
    %c0_i32_0 = arith.constant 0 : i32
    %c0_i32_1 = arith.constant 0 : i32
    return %c0_i32, %c0_i32_0 : i32, i32
  }
  func.func @transform_3(%arg0: i32) -> (i32, i32, i32) {
    %c0_i32 = arith.constant 0 : i32
    %c0_i32_0 = arith.constant 0 : i32
    %c0_i32_1 = arith.constant 0 : i32
    return %arg0, %c0_i32, %c0_i32_0 : i32, i32, i32
  }
}

</mosaic_0001>

<bundles_post_ra>
// kernel: tpu_custom_call.1
= control target key start
LH: loop header
LB: loop body
LE: loop exit
PB: predicated region body
PF: predicated region fallthrough
CT: control target
= control target key end

     0   :  { %8 = vsyncpa [#allocation4], 0  ;;  %s976_s0 = inlined_call_operand.vmem [shape: f32[2,4,256], index: 0, kind: input, shape index: {}]   ;;  %s977_s1 = inlined_call_operand.hbm [shape: f32[16,36], index: 1, kind: input, shape index: {}]   ;;  %s978_s2 = inlined_call_operand.vmem [shape: f32[16,1], index: 2, kind: input, shape index: {}]   ;;  %s979_s3 = inlined_call_operand.hbm [shape: f32[2,16,256], index: 3, kind: output, shape index: {}]  }
   0x1   :  { %9 = vsyncpa [#allocation5], 0 }
   0x2   :  { %11 = vsyncpa [#allocation5 + $0x1], 0  ;;  %s779_s12 = smov 0   ;;  %s781_s13 = smov 0  }
   0x3   :  { %s783_s14 = smov 0   ;;  %s785_s15 = smov 0  }
   0x4 LB: > { %s800_s16 = sadd.s32 4294967295, %s742_s15   ;;  %s548_s17 = sadd.s32 4294967294, %s742_s15   ;;  %s742_s15 = sphi %s785_s15, %s1003_s15   ;;  %s738_s14 = sphi %s783_s14, %s1002_s14   ;;  %s734_s13 = sphi %s781_s13, %s1001_s13   ;;  %s730_s12 = sphi %s779_s12, %s1000_s12  }
   0x5   : > { %s804_s18 = sadd.s32 1, %s742_s15   ;;  %s92_s19 = sadd.s32 1, %s738_s14 }
   0x6   : > { %s89_s20 = ssub.s32 %s742_s15, %s804_s18  ;;  %p102_p0 = scmp.ne.s32.totalorder %s738_s14, %s734_s13 }
   0x7   : > { %p90_p1 = scmp.eq.s32.totalorder %s89_s20, 0  ;;  %p103_p2 = scmp.eq.s32.totalorder %s800_s16, 1 }
   0x8   : > { %p108_p3 = scmp.ne.s32.totalorder %s734_s13, %s730_s12  ;;  %p109_p4 = scmp.eq.s32.totalorder %s548_s17, 1 }
   0x9   : > { %s815_s21 = scalar_select %p90_p1, %s738_s14, %s92_s19  }
   0xa   : > { %p817_p5 = por %p103_p2, %p102_p0  ;;  %p821_p6 = por %p109_p4, %p108_p3 }
   0xb   : > { %p549_p7 = scmp.ge.s32.totalorder %s742_s15, 1  ;;  %p116_p8 = scmp.lt.s32.totalorder %s742_s15, 3 }
   0xc   : > { %s983_s22 = scalar_select %p817_p5, 1, 0 }
   0xd   : > { %s984_s23 = scalar_select %p821_p6, 1, 0 }
   0xe   : > { %p980_p9 = scmp.eq.s32.totalorder %s800_s16, 0  ;;  %p828_p10 = pnand %p549_p7, %p116_p8 }
   0xf   : > { %s744_s25 = smov [#allocation3]   ;;  %s648_s30 = scalar_lea.hbm %s977_s1, 256 }
  0x10   : > { %s985_s24 = scalar_select %p828_p10, 1, 0 }
  0x11   : > { %s128_s26 = sshll.u32 %s744_s25, 4  ;;  %p588_p11 = pneg %p828_p10  ;;  %s129_s26 = int_to_ptr.vmem [resolvable:$true] %s128_s26 }
  0x12   : > { %p649_p13 = scmp.ne.s32.totalorder %s977_s1, %s648_s30  ;;  %p655_p3 = scmp.lt.u32.totalorder %s648_s30, %s977_s1 }
  0x13   : > { %p836_p12 = pnand %p980_p9, %p588_p11 }
  0x15   : > { %p650_p0 = pneg %p836_p12 }
  0x17   : > { %p651_p1 = pnand %p650_p0, %p649_p13 }
  0x19   : > { %p652_p2 = pneg %p651_p1 }
  0x1b   : > { %p657_p4 = pnand %p655_p3, %p652_p2 }
  0x1d   : > { %660 = shalt.err (!%p657_p4)
}
  0x1e   : > { %s661_s8 = scalar_lea.vmem %s129_s26, 256  ;;  %p669_p9 = scmp.lt.s32.totalorder %s129_s26, %s129_s26 }
  0x1f   : > { %p662_p7 = scmp.ne.s32.totalorder %s129_s26, %s661_s8  ;;  %p670_p6 = scmp.lt.s32.totalorder %s661_s8, %s661_s8 }
  0x21   : > { %p664_p8 = pnand %p662_p7, %p650_p0  ;;  %p671_p5 = por %p670_p6, %p669_p9 }
  0x23   : > { %p665_p11 = pneg %p664_p8 }
  0x25   : > { %p672_p10 = pnand %p671_p5, %p665_p11 }
  0x27   : > { %675 = shalt.err (!%p672_p10)
}
  0x28   : > { %s745_s9 = smov 128   ;;  %s746_s10 = smov 8  }
  0x29   : > { %591 = dma.hbm_to_vmem [thread:$0]  (!%p836_p12), %s977_s1, 256, %s129_s26, [#allocation4], %s745_s9, %s745_s9, %s746_s10  }
  0x2a   : > { %p987_p13 = scmp.ne.s32.totalorder %s985_s24, 0 }
  0x2b   : > { %p988_p1 = scmp.eq.s32.totalorder (!%p987_p13), %s800_s16, 0 }
  0x2c   : > { %155 = sbr.rel (%p987_p13) target bundleno = 446 (0x1be), region = 32 }
  0x33   : > { %721 = dma.done.wait (%p988_p1), [#allocation4], 256   ;;  %p989_p0 = pmov %p988_p1 }
  0x34   : > { %p179_p5 = scmp.lt.s32.totalorder %s800_s16, 1  ;;  %s747_s26 = smov 16   ;;  %v755_v2 = vmov 0.0   ;;  %v354_v3 = vld [vmem:[%s978_s2 + $0x8] sm:$0xff]  ;;  %v353_v4 = vld [vmem:[%s978_s2] sm:$0xff]  ;;  %v756_v5 = vmov 0   ;;  %v185_v6 = vlaneseq }
  0x35   : > { %723 = vsyncadd (%p989_p0), [#allocation4], 4294967040  ;;  %s748_s24 = smov 1   ;;  %s749_s29 = smov 17   ;;  %443 = vmatprep.mubr.f32.mxu0 %v755_v2  ;;  %449 = vmatprep.mubr.f32.mxu1 %v755_v2  ;;  %vm233_vm0 = vcmask 130048   ;;  %vm263_vm1 = vcmask 7168  }
  0x36   : > { %s180_s19 = scalar_select %p179_p5, %s800_s16, 1  ;;  %646 = vset.pattern.permute.xlu1 %v756_v5  ;;  %645 = vset.pattern.permute.xlu0 %v756_v5  ;;  %v186_v7 = vand.u32 127, %v185_v6  ;;  %vm218_vm3 = vcmask 138240   ;;  %vm248_vm5 = vcmask 121856   ;;  %vm285_vm8 = vcmask 1039360  }
  0x37   : > { %s750_s30 = smov 15   ;;  %s751_s4 = smov 127   ;;  %vm304_vm9 = vcmask 924672   ;;  %vm317_vm10 = vcmask 916480   ;;  %vm332_vm11 = vcmask 908288   ;;  %vm372_vm12 = vcmask 1043456  }
  0x38   : > { %s566_s20 = sshll.u32 %s180_s19, 3  ;;  %s752_s5 = smov 113   ;;  %v192_v8 = vand.u32 15, %v186_v7  ;;  %v187_v10 = vadd.s32 128, %v186_v7  ;;  %vm365_vm13 = vcmask 293888  }
  0x39   : > { %s183_s28 = scalar_lea.vmem %s976_s0, %s566_s20  ;;  %s753_s6 = smov 112  }
  0x3a   : > { %v184_v0 = vld [vmem:[%s183_s28] sm:$0xff]  ;;  %s754_s7 = smov 111   ;;  %vm875_vm2 = vcmp.ge.s32.totalorder %v192_v8, 1  ;;  %v199_v18 = vand.u32 15, %v187_v10  ;;  %vm897_vm6 = vcmp.lt.s32.totalorder %v192_v8, 15  ;;  %s176_s17 = sand.u32 1, %s734_s13  }
  0x3b   : > { %229 = vrot.lane.b32.xlu1 %v184_v0, %s747_s26  ;;  %279 = vst [vmem:[#allocation2 + $0x20] sm:$0xf] %v184_v0  ;;  %259 = vrot.lane.b32.xlu0 %v184_v0, %s748_s24  ;;  %v213_v1 = vcombine.high %v184_v0, %v184_v0  ;;  %s554_s19 = sshll.u32 %s176_s17, 5  ;;  %s567_s27 = sshll.u32 %s800_s16, 9 }
  0x3c   : > { %vm887_vm4 = vcmp.ge.s32.totalorder %v199_v18, 1  ;;  %vm901_vm7 = vcmp.lt.s32.totalorder %v199_v18, 15  ;;  %v342_v18 = vld [vmem:[#allocation3 + $0x8] sm:$0xff]  ;;  %s178_s20 = scalar_lea.vmem [#allocation6], %s554_s19  ;;  %s934_s16 = scalar_lea.sflag [#allocation5], %s176_s17 }
  0x3d   : > { %280 = vst [vmem:[#allocation2 + $0x28] sm:$0xf] %v213_v1  ;;  %s474_s25 = sshll.u32 %s178_s20, 4  ;;  %p998_p9 = scmp.ne.s32.totalorder %s983_s22, 0  ;;  %s927_s25 = int_to_ptr.vmem [resolvable:$true] %s474_s25 }
  0x3f   : > { %214 = vrot.lane.b32.xlu0 %v184_v0, %s749_s29  ;;  %231 = vrot.lane.b32.xlu1 %v213_v1, %s747_s26 }
  0x43   : > { %216 = vrot.lane.b32.xlu1 %v213_v1, %s749_s29  ;;  %261 = vrot.lane.b32.xlu0 %v213_v1, %s748_s24  ;;  %s932_s29 = scalar_lea.hbm %s979_s3, %s567_s27 }
  0x47   : > { %246 = vrot.lane.b32.xlu1 %v213_v1, %s750_s30  ;;  %244 = vrot.lane.b32.xlu0 %v184_v0, %s750_s30  ;;  %s676_s30 = scalar_lea.vmem %s927_s25, 512 }
  0x48   : > { %p677_p6 = scmp.ne.s32.totalorder %s927_s25, %s676_s30 }
  0x4a   : > { %p678_p10 = pnand %p677_p6, %p998_p9 }
  0x4b   : > { %281 = vrot.lane.b32.xlu1 %v184_v0, %s751_s4  ;;  %283 = vrot.lane.b32.xlu0 %v213_v1, %s751_s4  ;;  %s757_s4 = smov [#allocation6]  }
  0x4c   : > { %p679_p12 = pneg %p678_p10 }
  0x4f   : > { %302 = vrot.lane.b32.xlu1 %v213_v1, %s752_s5  ;;  %315 = vrot.lane.b32.xlu0 %v213_v1, %s753_s6 }
  0x53   : > { %300 = vrot.lane.b32.xlu1 %v184_v0, %s752_s5  ;;  %313 = vrot.lane.b32.xlu0 %v184_v0, %s753_s6  ;;  %s680_s5 = sshll.u32 %s757_s4, 4  ;;  %s681_s5 = int_to_ptr.vmem [resolvable:$false] %s680_s5 }
  0x54   : > { %s682_s6 = scalar_lea.vmem %s681_s5, 1024  ;;  %p683_p2 = scmp.lt.s32.totalorder %s927_s25, %s681_s5 }
  0x55   : > { %p684_p3 = scmp.lt.s32.totalorder %s682_s6, %s676_s30 }
  0x57   : > { %328 = vrot.lane.b32.xlu1 %v184_v0, %s754_s7  ;;  %330 = vrot.lane.b32.xlu0 %v213_v1, %s754_s7  ;;  %p685_p4 = por %p684_p3, %p683_p2 }
  0x59   : > { %p686_p7 = pnand %p685_p4, %p679_p12 }
  0x5b   : > { %362 = vperm.xlu1 %646, %v354_v3   ;;  %357 = vperm.xlu0 %645, %v353_v4  }
  0xad   : > { %v230_v11 = vpop.permute.xlu1 %229  ;;  %v260_v12 = vpop.permute.xlu0 %259 }
  0xae   : > { %v236_v13 = vsel %vm233_vm0, 0.0, %v230_v11  ;;  %v267_v14 = vsel %vm263_vm1, 0.0, %v260_v12 }
  0xaf   : > { %v238_v15 = vrot.slane %v236_v13, 4  ;;  %v268_v16 = vsel %vm875_vm2, %v267_v14, 0.0 }
  0xb0   : > { %v272_v17 = vrot.slane %v268_v16, 4 }
  0xb1   : > { %242 = vst [vmem:[#allocation2] sm:$0xf0] %v238_v15  ;;  %v215_v19 = vpop.permute.xlu0 %214  ;;  %v232_v20 = vpop.permute.xlu1 %231 }
  0xb2   : > { %276 = vst [vmem:[#allocation2 + $0x10] sm:$0xf0] %v272_v17  ;;  %v222_v21 = vsel %vm218_vm3, 0.0, %v215_v19  ;;  %v234_v22 = vsel %vm233_vm0, %v230_v11, %v232_v20  ;;  %v341_v17 = vld [vmem:[#allocation3] sm:$0xff] }
  0xb3   : > { %v225_v23 = vsel %vm875_vm2, %v222_v21, 0.0  ;;  %v239_v24 = vrot.slane %v234_v22, 4 }
  0xb4   : > { %227 = vst [vmem:[#allocation2] sm:$0xf] %v225_v23 }
  0xb5   : > { %243 = vst [vmem:[#allocation2 + $0x8] sm:$0xf0] %v239_v24  ;;  %v217_v26 = vpop.permute.xlu1 %216  ;;  %v262_v27 = vpop.permute.xlu0 %261 }
  0xb6   : > { %v219_v28 = vsel %vm218_vm3, %v215_v19, %v217_v26  ;;  %v264_v29 = vsel %vm263_vm1, %v260_v12, %v262_v27 }
  0xb7   : > { %v226_v30 = vsel %vm887_vm4, %v219_v28, 0.0  ;;  %v269_v31 = vsel %vm887_vm4, %v264_v29, 0.0 }
  0xb8   : > { %228 = vst [vmem:[#allocation2 + $0x8] sm:$0xf] %v226_v30  ;;  %v273_v32 = vrot.slane %v269_v31, 4 }
  0xb9   : > { %v247_v35 = vpop.permute.xlu1 %246  ;;  %v245_v36 = vpop.permute.xlu0 %244 }
  0xba   : > { %277 = vst [vmem:[#allocation2 + $0x18] sm:$0xf0] %v273_v32  ;;  %v249_v37 = vsel %vm248_vm5, %v245_v36, %v247_v35  ;;  %v252_v38 = vsel %vm248_vm5, 0.0, %v245_v36 }
  0xbb   : > { %v255_v39 = vsel %vm897_vm6, %v252_v38, 0.0  ;;  %v256_v40 = vsel %vm901_vm7, %v249_v37, 0.0  ;;  %v343_v53 = vld [vmem:[#allocation2] sm:$0xff] }
  0xbc   : > { %257 = vst [vmem:[#allocation2 + $0x10] sm:$0xf] %v255_v39  ;;  %258 = vst [vmem:[#allocation2 + $0x18] sm:$0xf] %v256_v40 }
  0xbd   : > { %v282_v41 = vpop.permute.xlu1 %281  ;;  %v284_v42 = vpop.permute.xlu0 %283 }
  0xbe   : > { %v286_v43 = vsel %vm285_vm8, %v282_v41, %v284_v42  ;;  %v289_v44 = vsel %vm285_vm8, %v284_v42, 0.0 }
  0xbf   : > { %v290_v45 = vsel %vm897_vm6, %v286_v43, 0.0  ;;  %v291_v46 = vsel %vm901_vm7, %v289_v44, 0.0  ;;  %v344_v56 = vld [vmem:[#allocation2 + $0x8] sm:$0xff] }
  0xc0   : > { %v294_v47 = vrot.slane %v290_v45, 4  ;;  %v295_v48 = vrot.slane %v291_v46, 4 }
  0xc1   : > { %v303_v49 = vpop.permute.xlu1 %302  ;;  %v316_v50 = vpop.permute.xlu0 %315 }
  0xc2   : > { %298 = vst [vmem:[#allocation2 + $0x20] sm:$0xf0] %v294_v47  ;;  %299 = vst [vmem:[#allocation2 + $0x28] sm:$0xf0] %v295_v48  ;;  %v308_v51 = vsel %vm304_vm9, %v303_v49, 0.0  ;;  %v320_v52 = vsel %vm317_vm10, %v316_v50, 0.0 }
  0xc3   : > { %v310_v54 = vsel %vm887_vm4, %v308_v51, 0.0  ;;  %v323_v55 = vrot.slane %v320_v52, 4  ;;  %v346_v57 = vld [vmem:[#allocation2 + $0x18] sm:$0xff]  ;;  %v345_v58 = vld [vmem:[#allocation2 + $0x10] sm:$0xff] }
  0xc4   : > { %312 = vst [vmem:[#allocation2 + $0x38] sm:$0xf] %v310_v54  ;;  %v568_v59 = vpack.c.bf16 %v346_v57, %v344_v56  ;;  %v570_v60 = vpack.c.bf16 %v345_v58, %v343_v53 }
  0xc5   : > { %327 = vst [vmem:[#allocation2 + $0x38] sm:$0xf0] %v323_v55  ;;  %v301_v61 = vpop.permute.xlu1 %300  ;;  %v314_v62 = vpop.permute.xlu0 %313 }
  0xc6   : > { %v305_v63 = vsel %vm304_vm9, %v301_v61, %v303_v49  ;;  %v318_v0 = vsel %vm317_vm10, %v314_v62, %v316_v50  ;;  %569 = vmatprep.subr.bf16.mxu0 %v568_v59  ;;  %576 = vmatprep.subr.bf16.mxu1 %v568_v59 }
  0xc7   : > { %v309_v1 = vsel %vm875_vm2, %v305_v63, 0.0  ;;  %v322_v2 = vrot.slane %v318_v0, 4  ;;  %571 = vmatpush1.bf16.msra.mxu0 %v570_v60  ;;  %579 = vmatpush1.bf16.msra.mxu1 %v570_v60 }
  0xc8   : > { %311 = vst [vmem:[#allocation2 + $0x30] sm:$0xf] %v309_v1 }
  0xc9   : > { %326 = vst [vmem:[#allocation2 + $0x30] sm:$0xf0] %v322_v2  ;;  %v329_v3 = vpop.permute.xlu1 %328  ;;  %v331_v4 = vpop.permute.xlu0 %330  ;;  %v348_v9 = vld [vmem:[#allocation2 + $0x28] sm:$0xff]  ;;  %v347_v12 = vld [vmem:[#allocation2 + $0x20] sm:$0xff] }
  0xca   : > { %v333_v5 = vsel %vm332_vm11, %v329_v3, %v331_v4  ;;  %v336_v6 = vsel %vm332_vm11, %v331_v4, 0.0 }
  0xcb   : > { %v337_v7 = vsel %vm897_vm6, %v333_v5, 0.0  ;;  %v338_v8 = vsel %vm901_vm7, %v336_v6, 0.0 }
  0xcc   : > { %339 = vst [vmem:[#allocation2 + $0x40] sm:$0xf] %v337_v7  ;;  %340 = vst [vmem:[#allocation2 + $0x48] sm:$0xf] %v338_v8  ;;  %v350_v10 = vld [vmem:[#allocation2 + $0x38] sm:$0xff] }
  0xcd   : > { %v572_v11 = vpack.c.bf16 %v350_v10, %v348_v9 }
  0xcf   : > { %573 = vmatprep.subr.bf16.mxu0 %v572_v11  ;;  %577 = vmatprep.subr.bf16.mxu1 %v572_v11 }
  0xd0   : > { %v349_v13 = vld [vmem:[#allocation2 + $0x30] sm:$0xff] }
  0xd1   : > { %v574_v14 = vpack.c.bf16 %v349_v13, %v347_v12 }
  0xd3   : > { %575 = vmatpush1.bf16.msra.mxu0 %v574_v14  ;;  %580 = vmatpush1.bf16.msra.mxu1 %v574_v14  ;;  %v352_v15 = vld [vmem:[#allocation2 + $0x48] sm:$0xf]  ;;  %v351_v16 = vld [vmem:[#allocation2 + $0x40] sm:$0xf] }
  0xd4   : > { %557 = vmatprep.subr.msk.mxu0 %vm372_vm12, %v352_v15  ;;  %578 = vmatprep.subr.msk.mxu1 %vm372_vm12, %v352_v15 }
  0xd7   : > { %558 = vmatpush1.msk.msra.mxu0 %vm372_vm12, %v351_v16  ;;  %581 = vmatpush1.msk.msra.mxu1 %vm372_vm12, %v351_v16 }
  0xd8   : > { %559 = vmatmul.mubr.msk.f32.vlgmr.msra.gmra.mrb[0].mxu0 %vm365_vm13, %v341_v17  ;;  %560 = vmatmul.mubr.msk.f32.vlgmr.msra.gmra.mrb[0].mxu1 %vm365_vm13, %v342_v18 }
  0xda   : > { %v363_v19 = vpop.permute.xlu1 %362  ;;  %v358_v20 = vpop.permute.xlu0 %357 }
 0x1ab   : > { %v445_v21 = vpop.f32.mrb[0].mxu0  ;;  %v451_v22 = vpop.f32.mrb[0].mxu1 }
 0x1ac   : > { %v446_v23 = vadd.f32 %v445_v21, %v358_v20  ;;  %v452_v24 = vadd.f32 %v451_v22, %v363_v19  ;;  %v447_v25 = vpop.f32.mrb[1].mxu0  ;;  %v453_v26 = vpop.f32.mrb[1].mxu1 }
 0x1ad   : > { %v448_v27 = vadd.f32 %v447_v25, %v358_v20  ;;  %v454_v28 = vadd.f32 %v453_v26, %v363_v19 }
 0x1ae   : > { %456 = vst [vmem:[%s178_s20] sm:$0xff] %v446_v23  ;;  %458 = vst [vmem:[%s178_s20 + $0x10] sm:$0xff] %v452_v24 }
 0x1af   : > { %457 = vst [vmem:[%s178_s20 + $0x8] sm:$0xff] %v448_v27  ;;  %459 = vst [vmem:[%s178_s20 + $0x18] sm:$0xff] %v454_v28 }
 0x1b0   : > { %689 = shalt.err (!%p686_p7)
}
 0x1b1   : > { %s690_s7 = scalar_lea.hbm %s932_s29, 512  ;;  %s694_s10 = scalar_lea.hbm %s979_s3, 1024 }
 0x1b2   : > { %p691_p8 = scmp.ne.s32.totalorder %s932_s29, %s690_s7  ;;  %p695_p1 = scmp.lt.u32.totalorder %s932_s29, %s979_s3 }
 0x1b3   : > { %p696_p0 = scmp.lt.u32.totalorder %s694_s10, %s690_s7  ;;  %p698_p6 = scmp.lt.u32.totalorder %s690_s7, %s932_s29 }
 0x1b4   : > { %p692_p11 = pnand %p691_p8, %p998_p9 }
 0x1b5   : > { %p697_p5 = por %p696_p0, %p695_p1 }
 0x1b6   : > { %p693_p13 = pneg %p692_p11 }
 0x1b7   : > { %p699_p10 = por %p698_p6, %p697_p5 }
 0x1b9   : > { %p700_p12 = pnand %p699_p10, %p693_p13 }
 0x1bb   : > { %703 = shalt.err (!%p700_p12)
}
 0x1bc   : > { %s758_s19 = smov 256  }
 0x1bd   : > { %586 = dma.vmem_to_hbm [thread:$0]  (%p998_p9), %s927_s25, 512, %s932_s29, %s934_s16, %s758_s19, %s758_s19, %s747_s26  }
 0x1be PF: > { %p598_p2 = scmp.ge.s32.totalorder %s742_s15, 2  ;;  %s489_s20 = sand.u32 1, %s730_s12  }
 0x1bf   : > { %p999_p3 = scmp.ne.s32.totalorder %s984_s23, 0  ;;  %s490_s27 = scalar_lea.sflag [#allocation5], %s489_s20 }
 0x1c1   : > { %p593_p4 = pnand %p598_p2, %p999_p3 }
 0x1c3   : > { %725 = dma.done.wait (!%p593_p4), %s490_s27, 512  }
 0x1c4   : > { %727 = vsyncadd (!%p593_p4), %s490_s27, 4294966784  ;;  %p14_p7 = scmp.ge.s32.totalorder %s804_s18, 4   ;;  %s1000_s12 = smov %s734_s13 }
 0x1c5   : > { %s1001_s13 = smov %s738_s14  ;;  %s1002_s14 = smov %s815_s21 }
 0x1c6   : > { %s1003_s15 = smov %s804_s18  ;;  %16 = sbr.rel (!%p14_p7) target bundleno = 4 (0x4), region = 72 }
 0x1cd   :  { %495 = vsyncpa [#allocation4], 1 }
 0x1ce   :  { %497 = vsyncpa [#allocation4 + $0x1], 1 }
 0x1cf   :  { %498 = vsyncpa [#allocation5], 1 }
 0x1d0   :  { %500 = vsyncpa [#allocation5 + $0x1], 1 }

</bundles_post_ra>
